<compile_context>
chip_gen: v6e
topology: v6e:2x2x1
jax: 0.10.0
libtpu: 0.0.40
codegen_flags: <defaults>
</compile_context>

<pallas_src>
import jax
import jax.numpy as jnp
from jax import lax
from jax.experimental import pallas as pl
from jax.experimental.pallas import tpu as pltpu


_MATMUL_DTYPE = jnp.bfloat16       # MXU-native operand dtype (f32 accumulation)
_VMEM_HEADROOM = 8 * 1024 * 1024   # leave room for Mosaic internal scratch
_VMEM_FLOOR = 32 * 1024 * 1024     # never request below the default scoped limit


def _vmem_cap():
    """Generation-aware scoped-VMEM cap: physical capacity minus headroom."""
    default_capacity = 64 * 1024 * 1024  # safe on every generation (v7x physical)
    try:
        info = pltpu.get_tpu_info()
        capacity = int(getattr(info, "vmem_capacity_bytes", default_capacity))
    except Exception:
        capacity = default_capacity
    cap = capacity - _VMEM_HEADROOM
    return int(min(112 * 1024 * 1024, max(48 * 1024 * 1024, cap)))


def _vmem_limit(estimate_bytes, cap):
    return int(min(cap, max(_VMEM_FLOOR, int(1.25 * estimate_bytes) + (2 << 20))))


def _softmax_from_energy(energy):
    # PyTorch does softmax(rowmax(E) - E); the standard row-max stabilization
    # of that is algebraically exp(rowmin(E) - E), fusing two reductions.
    row_min = jnp.min(energy, axis=-1, keepdims=True)
    e = jnp.exp(row_min - energy)
    denom = jnp.sum(e, axis=-1, keepdims=True)
    return e * pl.reciprocal(denom, approx=True)


# ----------------------------------------------------------------------------
# Monolithic path: one batch element per grid step, full (C, N) slab in VMEM.
# ----------------------------------------------------------------------------
def cam_kernel_monolithic(gamma_ref, x_ref, o_ref):
    x = x_ref[0]                                     # (C, N), input dtype
    xb = x.astype(_MATMUL_DTYPE)                     # bf16 MXU operands

    # energy = x @ x.T without materializing the transpose (NT dot_general).
    energy = lax.dot_general(
        xb, xb, dimension_numbers=(((1,), (1,)), ((), ())),
        preferred_element_type=jnp.float32)          # (C, C) f32

    attention = _softmax_from_energy(energy)         # (C, C) f32

    out = jnp.dot(attention.astype(_MATMUL_DTYPE), xb,
                  preferred_element_type=jnp.float32)  # (C, N) f32

    gamma = gamma_ref[0, 0]
    o_ref[0] = (gamma * out + x.astype(jnp.float32)).astype(o_ref.dtype)


# ----------------------------------------------------------------------------
# Tiled path: pass 1 accumulates energy over N tiles and emits bf16 attention,
# pass 2 applies attention @ x tile-by-tile (all grid axes parallel).
# ----------------------------------------------------------------------------
def cam_energy_kernel(x_ref, attn_ref, acc_ref):
    """c_tile == C: accumulate the full (C, C) energy over N tiles."""
    k = pl.program_id(1)

    @pl.when(k == 0)
    def _():
        acc_ref[...] = jnp.zeros_like(acc_ref)

    xb = x_ref[0].astype(_MATMUL_DTYPE)              # (C, n_tile)
    acc_ref[...] += lax.dot_general(
        xb, xb, dimension_numbers=(((1,), (1,)), ((), ())),
        preferred_element_type=jnp.float32)

    @pl.when(k == pl.num_programs(1) - 1)
    def _():
        attn_ref[0] = _softmax_from_energy(acc_ref[...]).astype(attn_ref.dtype)


def cam_energy_rowtiled_kernel(x_row_ref, x_full_ref, attn_ref, acc_ref):
    """c_tile < C: accumulate a (c_tile, C) row slab of the energy."""
    k = pl.program_id(2)

    @pl.when(k == 0)
    def _():
        acc_ref[...] = jnp.zeros_like(acc_ref)

    rows = x_row_ref[0].astype(_MATMUL_DTYPE)        # (c_tile, n_tile)
    full = x_full_ref[0].astype(_MATMUL_DTYPE)       # (C, n_tile)
    acc_ref[...] += lax.dot_general(
        rows, full, dimension_numbers=(((1,), (1,)), ((), ())),
        preferred_element_type=jnp.float32)          # (c_tile, C)

    @pl.when(k == pl.num_programs(2) - 1)
    def _():
        attn_ref[0] = _softmax_from_energy(acc_ref[...]).astype(attn_ref.dtype)


def cam_apply_kernel(gamma_ref, attn_ref, x_ref, o_ref):
    """out[:, n_tile] = gamma * (attention @ x[:, n_tile]) + x[:, n_tile]."""
    x = x_ref[0]                                     # (C, n_tile)
    attn = attn_ref[0]                               # (C, C), already bf16
    out = jnp.dot(attn, x.astype(attn.dtype),
                  preferred_element_type=jnp.float32)
    gamma = gamma_ref[0, 0]
    o_ref[0] = (gamma * out + x.astype(jnp.float32)).astype(o_ref.dtype)


def cam_apply_rowtiled_kernel(gamma_ref, attn_ref, x_full_ref, x_row_ref, o_ref):
    attn = attn_ref[0]                               # (c_tile, C), bf16
    xf = x_full_ref[0]                               # (C, n_tile)
    xr = x_row_ref[0]                                # (c_tile, n_tile)
    out = jnp.dot(attn, xf.astype(attn.dtype),
                  preferred_element_type=jnp.float32)
    gamma = gamma_ref[0, 0]
    o_ref[0] = (gamma * out + xr.astype(jnp.float32)).astype(o_ref.dtype)


# ----------------------------------------------------------------------------
# VMEM footprint estimates & tile selection
# ----------------------------------------------------------------------------
def _pass1_bytes(C, c_tile, n_tile, itemsize, rowtiled):
    x_row = 2 * c_tile * n_tile * itemsize                   # double-buffered
    x_full = (2 * C * n_tile * itemsize) if rowtiled else 0
    casts = (c_tile + (C if rowtiled else 0)) * n_tile * 2   # bf16 copies
    acc = c_tile * C * 4                                     # f32 accumulator
    softmax_tmp = 2 * c_tile * C * 4
    attn_out = 2 * c_tile * C * 2                            # bf16, double-buffered
    return x_row + x_full + casts + acc + softmax_tmp + attn_out


def _pass2_bytes(C, c_tile, n_tile, itemsize, rowtiled):
    attn = 2 * c_tile * C * 2                                # bf16 attention
    x_full = 2 * C * n_tile * itemsize + C * n_tile * 2
    x_row = (2 * c_tile * n_tile * itemsize) if rowtiled else 0
    out = 2 * c_tile * n_tile * itemsize + c_tile * n_tile * 4
    return attn + x_full + x_row + out


def _choose_tiles(C, N, itemsize, budget):
    """Pick (c_tile, n_tile, rowtiled) so both passes fit the VMEM budget."""
    n_pad128 = max(128, ((N + 127) // 128) * 128)
    n_cap = min(n_pad128, 8192)

    def best_fit(c_tile, rowtiled):
        best = None
        t = 128
        while t <= n_cap:
            if max(_pass1_bytes(C, c_tile, t, itemsize, rowtiled),
                   _pass2_bytes(C, c_tile, t, itemsize, rowtiled)) <= budget:
                best = t
            t += 128
        return best

    def balance(t_fit):
        # Split N into equal-ish lane-dense tiles so padding waste stays small.
        num_k = -(-n_pad128 // t_fit)
        per = -(-n_pad128 // num_k)
        return ((per + 127) // 128) * 128

    nt = best_fit(C, False)
    if nt is not None:
        return C, balance(nt), False

    # Row-tile C (divisors of C that are multiples of 16 -> bf16-friendly).
    for ct in sorted({d for d in range(16, C, 16) if C % d == 0}, reverse=True):
        nt = best_fit(ct, True)
        if nt is not None:
            return ct, balance(nt), True

    # Nothing fits the budget estimate; use the smallest tiles and let the
    # vmem_limit clamp to the generation cap.
    return C, 128, False


# ----------------------------------------------------------------------------
# Wrapper
# ----------------------------------------------------------------------------
def cam_module_forward(x, gamma, *, force_tiled=False, n_tile=None, c_tile=None):
    """x: (B, C, H, W); gamma: scalar parameter (shape (1,) or ())."""
    B, C, H, W = x.shape
    N = H * W
    x_flat = x.reshape(B, C, N)
    gamma_smem = jnp.asarray(gamma, jnp.float32).reshape(1, 1)
    itemsize = jnp.dtype(x.dtype).itemsize

    cap = _vmem_cap()
    mono_budget = int(0.8 * cap)      # ~45 MiB on v7x, ~90 MiB on v5e/v6e
    tile_budget = int(0.7 * cap)

    # Per-batch monolithic footprint: double-buffered in/out slabs + bf16 copy
    # + f32 output intermediate + (energy, exp, attention) (C,C) buffers.
    mono_est = 4 * C * N * itemsize + C * N * 2 + C * N * 4 + 3 * C * C * 4
    use_tiled = force_tiled or (mono_est > mono_budget)

    if not use_tiled:
        out_flat = pl.pallas_call(
            cam_kernel_monolithic,
            out_shape=jax.ShapeDtypeStruct((B, C, N), x.dtype),
            grid_spec=pltpu.PrefetchScalarGridSpec(
                num_scalar_prefetch=0,
                grid=(B,),
                in_specs=[
                    pl.BlockSpec((1, 1), lambda b: (0, 0),
                                 memory_space=pltpu.SMEM),        # gamma scalar
                    pl.BlockSpec((1, C, N), lambda b: (b, 0, 0)), # x slab
                ],
                out_specs=pl.BlockSpec((1, C, N), lambda b: (b, 0, 0)),
            ),
            compiler_params=pltpu.CompilerParams(
                dimension_semantics=("parallel",),
                vmem_limit_bytes=_vmem_limit(mono_est, cap)),
        )(gamma_smem, x_flat)
        return out_flat.reshape(B, C, H, W)

    # ---------------- Tiled two-pass path ----------------
    if n_tile is None or c_tile is None:
        auto_c, auto_n, _ = _choose_tiles(C, N, itemsize, tile_budget)
        if c_tile is None:
            c_tile = auto_c
        if n_tile is None:
            n_tile = auto_n
    rowtiled = c_tile < C
    num_rows = C // c_tile

    # Zero-pad N to a multiple of n_tile: padded columns contribute 0 to the
    # Gram matrix and are sliced off the output, keeping tiles lane-dense.
    N_pad = -(-N // n_tile) * n_tile
    x_work = x_flat if N_pad == N else jnp.pad(
        x_flat, ((0, 0), (0, 0), (0, N_pad - N)))
    num_k = N_pad // n_tile

    attn_dtype = _MATMUL_DTYPE   # bf16 attention -> half the HBM round-trip

    # ---- Pass 1: attention = softmax(rowmax(E) - E), E accumulated over N ----
    if not rowtiled:
        p1_est = _pass1_bytes(C, C, n_tile, itemsize, False)
        attention = pl.pallas_call(
            cam_energy_kernel,
            out_shape=jax.ShapeDtypeStruct((B, C, C), attn_dtype),
            grid_spec=pltpu.PrefetchScalarGridSpec(
                num_scalar_prefetch=0,
                grid=(B, num_k),
                in_specs=[pl.BlockSpec((1, C, n_tile), lambda b, k: (b, 0, k))],
                out_specs=pl.BlockSpec((1, C, C), lambda b, k: (b, 0, 0)),
                scratch_shapes=[pltpu.VMEM((C, C), jnp.float32)],
            ),
            compiler_params=pltpu.CompilerParams(
                dimension_semantics=("parallel", "arbitrary"),
                vmem_limit_bytes=_vmem_limit(p1_est, cap)),
        )(x_work)
    else:
        p1_est = _pass1_bytes(C, c_tile, n_tile, itemsize, True)
        attention = pl.pallas_call(
            cam_energy_rowtiled_kernel,
            out_shape=jax.ShapeDtypeStruct((B, C, C), attn_dtype),
            grid_spec=pltpu.PrefetchScalarGridSpec(
                num_scalar_prefetch=0,
                grid=(B, num_rows, num_k),
                in_specs=[
                    pl.BlockSpec((1, c_tile, n_tile), lambda b, i, k: (b, i, k)),
                    pl.BlockSpec((1, C, n_tile), lambda b, i, k: (b, 0, k)),
                ],
                out_specs=pl.BlockSpec((1, c_tile, C), lambda b, i, k: (b, i, 0)),
                scratch_shapes=[pltpu.VMEM((c_tile, C), jnp.float32)],
            ),
            compiler_params=pltpu.CompilerParams(
                dimension_semantics=("parallel", "parallel", "arbitrary"),
                vmem_limit_bytes=_vmem_limit(p1_est, cap)),
        )(x_work, x_work)

    # ---- Pass 2: out tile = gamma * (attention @ x tile) + x tile ----
    if not rowtiled:
        p2_est = _pass2_bytes(C, C, n_tile, itemsize, False)
        out_flat = pl.pallas_call(
            cam_apply_kernel,
            out_shape=jax.ShapeDtypeStruct((B, C, N_pad), x.dtype),
            grid_spec=pltpu.PrefetchScalarGridSpec(
                num_scalar_prefetch=0,
                grid=(B, num_k),
                in_specs=[
                    pl.BlockSpec((1, 1), lambda b, n: (0, 0),
                                 memory_space=pltpu.SMEM),            # gamma
                    pl.BlockSpec((1, C, C), lambda b, n: (b, 0, 0)),  # attention
                    pl.BlockSpec((1, C, n_tile), lambda b, n: (b, 0, n)),
                ],
                out_specs=pl.BlockSpec((1, C, n_tile), lambda b, n: (b, 0, n)),
            ),
            compiler_params=pltpu.CompilerParams(
                dimension_semantics=("parallel", "parallel"),
                vmem_limit_bytes=_vmem_limit(p2_est, cap)),
        )(gamma_smem, attention, x_work)
    else:
        p2_est = _pass2_bytes(C, c_tile, n_tile, itemsize, True)
        out_flat = pl.pallas_call(
            cam_apply_rowtiled_kernel,
            out_shape=jax.ShapeDtypeStruct((B, C, N_pad), x.dtype),
            grid_spec=pltpu.PrefetchScalarGridSpec(
                num_scalar_prefetch=0,
                grid=(B, num_rows, num_k),
                in_specs=[
                    pl.BlockSpec((1, 1), lambda b, i, n: (0, 0),
                                 memory_space=pltpu.SMEM),                # gamma
                    pl.BlockSpec((1, c_tile, C), lambda b, i, n: (b, i, 0)),
                    pl.BlockSpec((1, C, n_tile), lambda b, i, n: (b, 0, n)),
                    pl.BlockSpec((1, c_tile, n_tile), lambda b, i, n: (b, i, n)),
                ],
                out_specs=pl.BlockSpec((1, c_tile, n_tile),
                                       lambda b, i, n: (b, i, n)),
            ),
            compiler_params=pltpu.CompilerParams(
                dimension_semantics=("parallel", "parallel", "parallel"),
                vmem_limit_bytes=_vmem_limit(p2_est, cap)),
        )(gamma_smem, attention, x_work, x_work)

    if N_pad != N:
        out_flat = out_flat[:, :, :N]
    return out_flat.reshape(B, C, H, W)


# ----------------------------------------------------------------------------
# Pure-JAX reference matching the PyTorch forward.
# ----------------------------------------------------------------------------
def cam_module_ref(x, gamma, matmul_dtype=None):
    """If matmul_dtype is given, matmul operands are rounded to that dtype
    (with f32 accumulation), mirroring the kernel's bf16 MXU operands."""
    B, C, H, W = x.shape
    q = x.reshape(B, C, -1).astype(jnp.float32)
    qm = q if matmul_dtype is None else q.astype(matmul_dtype)
    energy = jnp.einsum("bcn,bdn->bcd", qm, qm,
                        preferred_element_type=jnp.float32)
    max_e = jnp.max(energy, axis=-1, keepdims=True)
    energy_new = max_e - energy
    attention = jax.nn.softmax(energy_new, axis=-1)
    am = attention if matmul_dtype is None else attention.astype(matmul_dtype)
    out = jnp.einsum("bcd,bdn->bcn", am, qm,
                     preferred_element_type=jnp.float32).reshape(B, C, H, W)
    return jnp.asarray(gamma, jnp.float32).reshape(()) * out + x.astype(jnp.float32)


if __name__ == "__main__":
    root = jax.random.PRNGKey(0)
    k1, k2, k3, k4 = jax.random.split(root, 4)

    # --- Monolithic path (small C, full-slab blocks) ---
    B, C, H, W = 2, 4, 16, 16
    x = jax.random.normal(k1, (B, C, H, W), dtype=jnp.float32)

    # gamma = zeros(1) per module __init__: output must equal the input.
    gamma0 = jnp.zeros((1,), dtype=jnp.float32)
    out0 = jax.block_until_ready(cam_module_forward(x, gamma0))
    assert out0.shape == (B, C, H, W)
    assert jnp.allclose(out0, x, atol=1e-6)
    assert jnp.allclose(out0, cam_module_ref(x, gamma0), atol=1e-6)

    # Nonzero gamma exercises the Gram / softmax / attention-value matmuls.
    gamma1 = jnp.array([0.5], dtype=jnp.float32)
    out1 = jax.block_until_ready(cam_module_forward(x, gamma1))
    ref1 = cam_module_ref(x, gamma1, matmul_dtype=jnp.bfloat16)
    assert jnp.allclose(out1, ref1, atol=2e-2, rtol=2e-2)

    # --- N-tiled two-pass path (forced, >1 N tile, bf16 attention) ---
    B2, C2, H2, W2 = 2, 8, 16, 16
    x2 = jax.random.normal(k2, (B2, C2, H2, W2), dtype=jnp.float32)
    gamma2 = jnp.array([0.7], dtype=jnp.float32)
    out2 = jax.block_until_ready(
        cam_module_forward(x2, gamma2, force_tiled=True, n_tile=128))
    ref2 = cam_module_ref(x2, gamma2, matmul_dtype=jnp.bfloat16)
    assert out2.shape == (B2, C2, H2, W2)
    assert jnp.allclose(out2, ref2, atol=2e-2, rtol=2e-2)

    # --- C-row-tiled path (forced: c_tile < C), exercises the v7x large-C path ---
    B3, C3, H3, W3 = 2, 32, 16, 16
    x3 = jax.random.normal(k3, (B3, C3, H3, W3), dtype=jnp.float32)
    gamma3 = jnp.array([0.3], dtype=jnp.float32)
    out3 = jax.block_until_ready(
        cam_module_forward(x3, gamma3, force_tiled=True, n_tile=128, c_tile=16))
    ref3 = cam_module_ref(x3, gamma3, matmul_dtype=jnp.bfloat16)
    assert out3.shape == (B3, C3, H3, W3)
    assert jnp.allclose(out3, ref3, atol=2e-2, rtol=2e-2)

    # --- Tiled path with N not a multiple of 128 (zero-padding path) ---
    B4, C4, H4, W4 = 1, 8, 10, 10
    x4 = jax.random.normal(k4, (B4, C4, H4, W4), dtype=jnp.float32)
    gamma4 = jnp.array([0.9], dtype=jnp.float32)
    out4 = jax.block_until_ready(
        cam_module_forward(x4, gamma4, force_tiled=True, n_tile=128))
    ref4 = cam_module_ref(x4, gamma4, matmul_dtype=jnp.bfloat16)
    assert out4.shape == (B4, C4, H4, W4)
    assert jnp.allclose(out4, ref4, atol=2e-2, rtol=2e-2)

    print("KERNEL_OK")
</pallas_src>

<mosaic_0001>
module attributes {stable_mosaic.version = 11 : i64} {
  func.func @cam_kernel_monolithic(%arg0: i32, %arg1: memref<1x1xf32, #tpu.memory_space<smem>>, %arg2: memref<1x4x256xf32, #tpu.memory_space<vmem>>, %arg3: memref<1x4x256xf32, #tpu.memory_space<vmem>>) attributes {dimension_semantics = [#tpu.dimension_semantics<parallel>], iteration_bounds = array<i64: 2>, scalar_prefetch = 0 : i64, scratch_operands = 0 : i64, tpu.core_type = #tpu.core_type<tc>, window_params = [{transform_indices = @transform_0, window_bounds = array<i64: 1, 1>}, {transform_indices = @transform_1, window_bounds = array<i64: 1, 4, 256>}, {transform_indices = @transform_2, window_bounds = array<i64: 1, 4, 256>}]} {
    %c0 = arith.constant 0 : index
    %c0_0 = arith.constant 0 : index
    %c0_1 = arith.constant 0 : index
    %0 = vector.load %arg2[%c0, %c0_0, %c0_1] : memref<1x4x256xf32, #tpu.memory_space<vmem>>, vector<1x4x256xf32>
    %1 = vector.shape_cast %0 : vector<1x4x256xf32> to vector<4x256xf32>
    %2 = arith.truncf %1 : vector<4x256xf32> to vector<4x256xbf16>
    %cst = arith.constant dense<0.000000e+00> : vector<4x4xf32>
    %3 = tpu.matmul %2, %2, %cst {dimension_numbers = #tpu.dot_dimension_numbers<[1], [1], [0], [0], [0, 0, 1, 0], [], []>} : vector<4x256xbf16>, vector<4x256xbf16>, vector<4x4xf32> -> vector<4x4xf32>
    %cst_2 = arith.constant dense<0x7F800000> : vector<4xf32>
    %4 = vector.multi_reduction <minimumf>, %3, %cst_2 [1] : vector<4x4xf32> to vector<4xf32>
    %5 = vector.shape_cast %4 : vector<4xf32> to vector<4x1xf32>
    %6 = vector.broadcast %5 : vector<4x1xf32> to vector<4x4xf32>
    %7 = arith.subf %6, %3 : vector<4x4xf32>
    %8 = math.exp %7 : vector<4x4xf32>
    %cst_3 = arith.constant dense<0.000000e+00> : vector<4xf32>
    %9 = vector.multi_reduction <add>, %8, %cst_3 [1] : vector<4x4xf32> to vector<4xf32>
    %10 = vector.shape_cast %9 : vector<4xf32> to vector<4x1xf32>
    %11 = tpu.reciprocal %10 {approx = true} : vector<4x1xf32> -> vector<4x1xf32>
    %12 = vector.broadcast %11 : vector<4x1xf32> to vector<4x4xf32>
    %13 = arith.mulf %8, %12 : vector<4x4xf32>
    %14 = arith.truncf %13 : vector<4x4xf32> to vector<4x4xbf16>
    %cst_4 = arith.constant dense<0.000000e+00> : vector<4x256xf32>
    %15 = tpu.matmul %14, %2, %cst_4 {dimension_numbers = #tpu.dot_dimension_numbers<[1], [0], [0], [1], [0, 0, 1, 1], [], []>} : vector<4x4xbf16>, vector<4x256xbf16>, vector<4x256xf32> -> vector<4x256xf32>
    %c0_5 = arith.constant 0 : index
    %c0_6 = arith.constant 0 : index
    %16 = memref.load %arg1[%c0_5, %c0_6] : memref<1x1xf32, #tpu.memory_space<smem>>
    %17 = vector.broadcast %16 : f32 to vector<4x256xf32>
    %18 = arith.mulf %17, %15 : vector<4x256xf32>
    %19 = arith.addf %18, %1 : vector<4x256xf32>
    %c0_7 = arith.constant 0 : index
    %c0_8 = arith.constant 0 : index
    %c0_9 = arith.constant 0 : index
    %20 = vector.load %arg3[%c0_7, %c0_8, %c0_9] : memref<1x4x256xf32, #tpu.memory_space<vmem>>, vector<1x4x256xf32>
    %21 = vector.shape_cast %20 : vector<1x4x256xf32> to vector<4x256xf32>
    %22 = vector.shape_cast %19 : vector<4x256xf32> to vector<1x4x256xf32>
    tpu.vector_store %arg3[%c0_7, %c0_8, %c0_9], %22 {strides = array<i32>} : memref<1x4x256xf32, #tpu.memory_space<vmem>>, vector<1x4x256xf32>,
    return
  }
  func.func @transform_0(%arg0: i32) -> (i32, i32) {
    %c0_i32 = arith.constant 0 : i32
    %c0_i32_0 = arith.constant 0 : i32
    %c0_i32_1 = arith.constant 0 : i32
    return %c0_i32, %c0_i32_0 : i32, i32
  }
  func.func @transform_1(%arg0: i32) -> (i32, i32, i32) {
    %c0_i32 = arith.constant 0 : i32
    %c0_i32_0 = arith.constant 0 : i32
    %c0_i32_1 = arith.constant 0 : i32
    return %arg0, %c0_i32, %c0_i32_0 : i32, i32, i32
  }
  func.func @transform_2(%arg0: i32) -> (i32, i32, i32) {
    %c0_i32 = arith.constant 0 : i32
    %c0_i32_0 = arith.constant 0 : i32
    %c0_i32_1 = arith.constant 0 : i32
    return %arg0, %c0_i32, %c0_i32_0 : i32, i32, i32
  }
}

</mosaic_0001>

<bundles_post_ra>
// kernel: tpu_custom_call.1
= control target key start
LH: loop header
LB: loop body
LE: loop exit
PB: predicated region body
PF: predicated region fallthrough
CT: control target
= control target key end

     0   :  { %s699_s0 = inlined_call_operand.<no memory space> [shape: f32[1,1], index: 0, kind: input, shape index: {}]   ;;  %s700_s1 = inlined_call_operand.hbm [shape: f32[2,4,256], index: 1, kind: input, shape index: {}]   ;;  %s701_s2 = inlined_call_operand.hbm [shape: f32[2,4,256], index: 2, kind: output, shape index: {}]  }
   0x1   :  { %7 = sst [smem:[#allocation2]] %s699_s0 }
   0x2   :  { %8 = vsyncpa [#allocation4], 0 }
   0x3   :  { %10 = vsyncpa [#allocation4 + $0x1], 0 }
   0x4   :  { %11 = vsyncpa [#allocation5], 0 }
   0x5   :  { %13 = vsyncpa [#allocation5 + $0x1], 0  ;;  %s554_s11 = smov 0   ;;  %s556_s12 = smov 0  }
   0x6   :  { %s558_s13 = smov 0   ;;  %s560_s14 = smov 0  }
   0x7 LB: > { %s575_s0 = sadd.s32 4294967295, %s531_s14   ;;  %s369_s15 = sadd.s32 4294967294, %s531_s14   ;;  %s531_s14 = sphi %s560_s14, %s718_s14   ;;  %s527_s13 = sphi %s558_s13, %s717_s13   ;;  %s523_s12 = sphi %s556_s12, %s716_s12   ;;  %s519_s11 = sphi %s554_s11, %s715_s11  }
   0x8   : > { %s579_s16 = sadd.s32 1, %s531_s14   ;;  %s47_s17 = sadd.s32 1, %s527_s13 }
   0x9   : > { %s44_s18 = ssub.s32 %s531_s14, %s579_s16  ;;  %p54_p0 = scmp.ne.s32.totalorder %s527_s13, %s523_s12 }
   0xa   : > { %p45_p1 = scmp.eq.s32.totalorder %s44_s18, 0  ;;  %p55_p2 = scmp.eq.s32.totalorder %s531_s14, 0 }
   0xb   : > { %p60_p3 = scmp.ne.s32.totalorder %s523_s12, %s519_s11  ;;  %p61_p4 = scmp.eq.s32.totalorder %s575_s0, 0 }
   0xc   : > { %s591_s19 = scalar_select %p45_p1, %s527_s13, %s47_s17  }
   0xd   : > { %p593_p5 = por %p55_p2, %p54_p0  ;;  %p597_p6 = por %p61_p4, %p60_p3 }
   0xe   : > { %p84_p7 = scmp.eq.s32.totalorder %s575_s0, 1  ;;  %p90_p8 = scmp.eq.s32.totalorder %s369_s15, 1 }
   0xf   : > { %s705_s21 = scalar_select %p597_p6, 1, 0 }
  0x10   : > { %p399_p10 = scmp.lt.s32.totalorder %s531_s14, 2  ;;  %p604_p11 = por %p84_p7, %p54_p0 }
  0x11   : > { %p608_p12 = por %p90_p8, %p60_p3  ;;  %s113_s24 = sand.u32 1, %s527_s13  }
  0x12   : > { %s706_s22 = scalar_select %p604_p11, 1, 0 }
  0x13   : > { %s707_s23 = scalar_select %p608_p12, 1, 0 }
  0x14   : > { %s385_s25 = sshll.u32 %s531_s14, 7  ;;  %s372_s26 = sshll.u32 %s113_s24, 3 }
  0x15   : > { %s617_s29 = scalar_lea.hbm %s700_s1, %s385_s25  ;;  %s117_s30 = scalar_lea.vmem [#allocation3], %s372_s26 }
  0x16   : > { %s125_s3 = sshll.u32 %s117_s30, 4  ;;  %p621_p13 = pnand %p399_p10, %p593_p5  ;;  %s625_s3 = int_to_ptr.vmem [resolvable:$true] %s125_s3 }
  0x17   : > { %s114_s5 = scalar_lea.sflag [#allocation4], %s113_s24  ;;  %s439_s6 = scalar_lea.hbm %s617_s29, 128 }
  0x18   : > { %p440_p2 = scmp.ne.s32.totalorder %s617_s29, %s439_s6  ;;  %p441_p3 = pneg %p621_p13 }
  0x19   : > { %s444_s9 = scalar_lea.hbm %s700_s1, 256  ;;  %p445_p5 = scmp.lt.s32.totalorder %s617_s29, %s700_s1 }
  0x1a   : > { %p442_p4 = pnand %p441_p3, %p440_p2  ;;  %p446_p8 = scmp.lt.s32.totalorder %s444_s9, %s439_s6 }
  0x1c   : > { %p443_p7 = pneg %p442_p4  ;;  %p447_p10 = por %p446_p8, %p445_p5 }
  0x1e   : > { %p448_p9 = pnand %p447_p10, %p443_p7 }
  0x20   : > { %451 = shalt.err (!%p448_p9)
}
  0x21   : > { %s452_s17 = scalar_lea.vmem %s625_s3, 128  ;;  %s533_s18 = smov [#allocation3]  }
  0x22   : > { %p453_p0 = scmp.ne.s32.totalorder %s625_s3, %s452_s17  ;;  %s457_s20 = sshll.u32 %s533_s18, 4  ;;  %s458_s20 = int_to_ptr.vmem [resolvable:$false] %s457_s20 }
  0x23   : > { %s459_s24 = scalar_lea.vmem %s458_s20, 256  ;;  %p460_p4 = scmp.lt.s32.totalorder %s625_s3, %s458_s20 }
  0x24   : > { %p455_p1 = pnand %p453_p0, %p441_p3  ;;  %p461_p12 = scmp.lt.s32.totalorder %s459_s24, %s452_s17 }
  0x26   : > { %p456_p2 = pneg %p455_p1  ;;  %p462_p11 = por %p461_p12, %p460_p4 }
  0x28   : > { %p463_p6 = pnand %p462_p11, %p456_p2 }
  0x2a   : > { %466 = shalt.err (!%p463_p6)
}
  0x2b   : > { %394 = dma.hbm_to_vmem [thread:$0]  (!%p621_p13), %s617_s29, 128, %s625_s3, %s114_s5  }
  0x2c   : > { %p709_p9 = scmp.lt.s32.totalorder %s531_s14, 3  ;;  %p710_p7 = scmp.ge.s32.totalorder %s531_s14, 1 }
  0x2e   : > { %p131_p0 = pnand %p710_p7, %p709_p9 }
  0x2f   : > { %s652_s25 = sand.u32 (!%p131_p0), 1, %s523_s12   ;;  %p711_p6 = scmp.ne.s32.totalorder (!%p131_p0), %s705_s21, 0 }
  0x30   : > { %134 = sbr.rel (%p131_p0) target bundleno = 788 (0x314), region = 28  ;;  %s376_s26 = sshll.u32 (!%p131_p0), %s652_s25, 3 }
  0x31   : > { %s137_s27 = scalar_lea.sflag (!%p131_p0), [#allocation4], %s652_s25  ;;  %s140_s28 = scalar_lea.vmem (!%p131_p0), [#allocation3], %s376_s26 }
  0x35   : > { %510 = dma.done.wait (%p711_p6), %s137_s27, 128  }
  0x36   : > { %512 = vsyncadd (%p711_p6), %s137_s27, 4294967168  ;;  %v162_v0 = vld [vmem:[%s140_s28] sm:$0xff]  ;;  %vm208_vm0 = vcmask 27648   ;;  %vm225_vm1 = vcmask 1041408   ;;  %v534_v15 = vmov 0   ;;  %vm221_vm2 = vcmask 31744  }
  0x37   : > { %v164_v1 = vcombine.high %v162_v0, %v162_v0  ;;  %v166_v2 = vpack.c.bf16 %v162_v0, %v162_v0  ;;  %264 = vmatprep.mubr.bf16.mxu1 %v534_v15  ;;  %s273_s21 = sld [smem:[#allocation2]]  ;;  %s386_s29 = sshll.u32 %s575_s0, 7 }
  0x38   : > { %s160_s30 = scalar_lea.vmem [#allocation6], %s376_s26  ;;  %s297_s6 = scalar_lea.hbm %s701_s2, %s386_s29 }
  0x39   : > { %v167_v3 = vpack.c.bf16 %v164_v1, %v164_v1  ;;  %v227_v14 = vsel %vm225_vm1, %v166_v2, 0  ;;  %s299_s3 = sshll.u32 %s160_s30, 4  ;;  %s285_s7 = scalar_lea.sflag [#allocation5], %s652_s25  ;;  %s300_s3 = int_to_ptr.vmem [resolvable:$true] %s299_s3 }
  0x3a   : > { %s467_s8 = scalar_lea.vmem %s300_s3, 128  ;;  %p712_p12 = scmp.ne.s32.totalorder %s706_s22, 0 }
  0x3b   : > { %182 = vmatprep.subr.bf16.mxu0 %v167_v3  ;;  %200 = vmatprep.mubr.bf16.mxu0 %v167_v3  ;;  %p468_p11 = scmp.ne.s32.totalorder %s300_s3, %s467_s8  ;;  %s535_s0 = smov [#allocation6]  }
  0x3c   : > { %183 = vmatpush1.bf16.xpose.msra.mxu0 %v166_v2  ;;  %378 = vmatprep.subr.msk.bf16.mxu1 %vm225_vm1, %v167_v3  ;;  %s471_s9 = sshll.u32 %s535_s0, 4  ;;  %s472_s9 = int_to_ptr.vmem [resolvable:$false] %s471_s9 }
  0x3d   : > { %247 = vmatpush1.bf16.msra.mxu1 %v227_v14  ;;  %v274_v20 = vstv %s273_s21  ;;  %p469_p13 = pnand %p468_p11, %p712_p12  ;;  %s473_s10 = scalar_lea.vmem %s472_s9, 256 }
  0x3e   : > { %p474_p3 = scmp.lt.s32.totalorder %s300_s3, %s472_s9  ;;  %p475_p5 = scmp.lt.s32.totalorder %s473_s10, %s467_s8 }
  0x3f   : > { %p470_p1 = pneg %p469_p13 }
  0x40   : > { %p476_p8 = por %p475_p5, %p474_p3 }
  0x42   : > { %p477_p10 = pnand %p476_p8, %p470_p1 }
  0x43   : > { %201 = vmatmul.mubr.bf16.vlgmr.msra.gmra.mxu0 %v166_v2 }
 0x103   : > { %v202_v4 = vpop.f32.mrf.mxu0 }
 0x104   : > { %v209_v5 = vsel %vm208_vm0, %v202_v4, inf }
 0x105   : > { %210 = vmin.xlane.f32.xlu0 %v209_v5  ;;  %v204_v6 = vpop.f32.mrf.mxu0 }
 0x107   : > { %v205_v7 = vpop.f32.mrf.mxu0 }
 0x109   : > { %v206_v8 = vpop.f32.mrf.mxu0 }
 0x18e   : > { %v211_v9 = vpop.xlane.xlu0 %210 }
 0x18f   : > { %v212_v10 = vsub.f32 %v211_v9, %v202_v4 }
 0x191   : > { %v213_v11 = vmul.f32 1.442695, %v212_v10 }
 0x193   : > { %435 = vpow2.f32 %v213_v11 }
 0x1a0   : > { %v436_v12 = vpop.eup %435 }
 0x1a1   : > { %v215_v13 = vsel %vm208_vm0, %v436_v12, 0.0 }
 0x1a2   : > { %216 = vadd.xlane.f32.xlu0 %v215_v13 }
 0x22b   : > { %v217_v16 = vpop.xlane.xlu0 %216 }
 0x22c   : > { %437 = vrcp.f32 %v217_v16 }
 0x239   : > { %v438_v17 = vpop.eup %437 }
 0x23a   : > { %v219_v18 = vmul.f32 %v438_v17, %v436_v12 }
 0x23c   : > { %v220_v19 = vpack.c.bf16 %v219_v18, %v219_v18 }
 0x23e   : > { %379 = vmatmul.mubr.msk.bf16.vlgmr.msra.gmra.mxu1 %vm221_vm2, %v220_v19 }
 0x2fe   : > { %v266_v21 = vpop.f32.mrf.mxu1 }
 0x2ff   : > { %v275_v22 = vmul.f32 %v274_v20, %v266_v21 }
 0x300   : > { %v268_v23 = vpop.f32.mrf.mxu1 }
 0x301   : > { %v276_v24 = vmul.f32 %v274_v20, %v268_v23  ;;  %v277_v26 = vadd.f32 %v275_v22, %v162_v0 }
 0x302   : > { %v270_v25 = vpop.f32.mrf.mxu1 }
 0x303   : > { %v278_v27 = vadd.f32 %v276_v24, %v164_v1 }
 0x304   : > { %v271_v28 = vpop.f32.mrf.mxu1 }
 0x305   : > { %v281_v29 = vcombine.low %v277_v26, %v278_v27 }
 0x307   : > { %283 = vst [vmem:[%s160_s30] sm:$0xff] %v281_v29 }
 0x308   : > { %480 = shalt.err (!%p477_p10)
}
 0x309   : > { %s481_s15 = scalar_lea.hbm %s297_s6, 128  ;;  %s485_s20 = scalar_lea.hbm %s701_s2, 256 }
 0x30a   : > { %p482_p2 = scmp.ne.s32.totalorder %s297_s6, %s481_s15  ;;  %p486_p7 = scmp.lt.s32.totalorder %s297_s6, %s701_s2 }
 0x30b   : > { %p487_p0 = scmp.lt.s32.totalorder %s485_s20, %s481_s15 }
 0x30c   : > { %p483_p4 = pnand %p482_p2, %p712_p12 }
 0x30d   : > { %p488_p6 = por %p487_p0, %p486_p7 }
 0x30e   : > { %p484_p9 = pneg %p483_p4 }
 0x310   : > { %p489_p11 = pnand %p488_p6, %p484_p9 }
 0x312   : > { %492 = shalt.err (!%p489_p11)
}
 0x313   : > { %389 = dma.vmem_to_hbm [thread:$0]  (%p712_p12), %s300_s3, 128, %s297_s6, %s285_s7  }
 0x314 PF: > { %s311_s26 = sand.u32 1, %s519_s11   ;;  %p713_p13 = scmp.ne.s32.totalorder %s707_s23, 0 }
 0x315   : > { %p714_p1 = scmp.ge.s32.totalorder %s531_s14, 2  ;;  %s312_s27 = scalar_lea.sflag [#allocation5], %s311_s26 }
 0x317   : > { %p396_p3 = pnand %p714_p1, %p713_p13 }
 0x319   : > { %p397_p5 = pneg %p396_p3 }
 0x31b   : > { %514 = dma.done.wait (%p397_p5), %s312_s27, 128  }
 0x31c   : > { %516 = vsyncadd (%p397_p5), %s312_s27, 4294967168  ;;  %p16_p8 = scmp.ge.s32.totalorder %s579_s16, 4   ;;  %s715_s11 = smov %s523_s12 }
 0x31d   : > { %s716_s12 = smov %s527_s13  ;;  %s717_s13 = smov %s591_s19 }
 0x31e   : > { %s718_s14 = smov %s579_s16  ;;  %18 = sbr.rel (!%p16_p8) target bundleno = 7 (0x7), region = 73 }
 0x323   :  { %317 = vsyncpa [#allocation4], 1 }
 0x324   :  { %319 = vsyncpa [#allocation4 + $0x1], 1 }
 0x325   :  { %320 = vsyncpa [#allocation5], 1 }
 0x326   :  { %322 = vsyncpa [#allocation5 + $0x1], 1 }

</bundles_post_ra>
